<compile_context>
chip_gen: v7x
topology: tpu7x:2x2x1
jax: 0.10.0
libtpu: 0.0.40
codegen_flags: <defaults>
</compile_context>

<pallas_src>
import functools

import jax
import jax.numpy as jnp
from jax.experimental import pallas as pl
from jax.experimental.pallas import tpu as pltpu


def _round_up(x: int, m: int) -> int:
    return ((x + m - 1) // m) * m


def _bottom_up_kernel(feat_ref, w_ref, b_ref, out_ref):
    # feat_ref: (TM, K) row tile           (native dtype -> MXU)
    # w_ref:    (K, Dp) full weight, resident across grid (Dp = pad(D, 128))
    # b_ref:    (1, Dp) bias
    # out_ref:  (TM, Dp) lane-dense output tile
    y = jnp.dot(feat_ref[...], w_ref[...], preferred_element_type=jnp.float32)
    y = y + b_ref[...].astype(jnp.float32)              # broadcast (1, Dp)
    # F.normalize(dim=-1): y / max(||y||, 1e-12)  ==  y * rsqrt(max(sq, 1e-24))
    sq = jnp.sum(y * y, axis=-1, keepdims=True)         # (TM, 1)
    inv = jax.lax.rsqrt(jnp.maximum(sq, 1e-24))         # EUP, not VPU divide
    out_ref[...] = (y * inv).astype(out_ref.dtype)


def prepare_params(weight, bias):
    """One-time parameter prep (hoisted out of the per-call path).

    weight: (dim, 2048) PyTorch Linear layout; bias: (dim,).
    Returns (w_padded (K, Dp), b_padded (1, Dp), dim).
    """
    D, K = weight.shape
    Dp = _round_up(D, 128)
    w_t = jnp.transpose(weight, (1, 0))                  # (K, D)
    w_p = jnp.pad(w_t, ((0, 0), (0, Dp - D)))            # zero cols: norm unchanged
    b_p = jnp.pad(bias, (0, Dp - D)).reshape(1, Dp)
    return w_p, b_p, D


@functools.partial(jax.jit, static_argnames=("dim",))
def bottom_up_extract(feat, w_p, b_p, dim):
    """feat: (B, N, 2048); w_p: (2048, Dp); b_p: (1, Dp). Returns (B, N, dim)."""
    B, N, K = feat.shape
    Dp = w_p.shape[1]

    # Flatten (B, N) -> M rows and tile rows for the MXU / HBM pipeline.
    M = B * N
    x = feat.reshape(M, K)
    TM = min(512, _round_up(M, 8))                       # row tile (mult. of 8)
    Mp = _round_up(M, TM)
    if Mp != M:
        x = jnp.pad(x, ((0, Mp - M), (0, 0)))            # zero rows, sliced later

    out = pl.pallas_call(
        _bottom_up_kernel,
        out_shape=jax.ShapeDtypeStruct((Mp, Dp), feat.dtype),
        grid=(Mp // TM,),
        in_specs=[
            pl.BlockSpec((TM, K), lambda i: (i, 0)),     # feat row tile
            pl.BlockSpec((K, Dp), lambda i: (0, 0)),     # weight, resident
            pl.BlockSpec((1, Dp), lambda i: (0, 0)),     # bias, resident
        ],
        out_specs=pl.BlockSpec((TM, Dp), lambda i: (i, 0)),
        compiler_params=pltpu.CompilerParams(
            dimension_semantics=("parallel",)),
    )(x, w_p, b_p)

    # Slice off row padding and lane padding outside the kernel.
    return out[:M, :dim].reshape(B, N, dim)


def _reference(feat, weight, bias):
    y = jnp.einsum("bnk,dk->bnd", feat, weight) + bias
    norm = jnp.maximum(jnp.linalg.norm(y, axis=2, keepdims=True), 1e-12)
    return y / norm


if __name__ == "__main__":
    key = jax.random.PRNGKey(0)
    k_feat, k_w, k_b = jax.random.split(key, 3)

    B, N, K, DIM = 2, 8, 2048, 32                        # small synthetic shapes
    feat = jax.random.normal(k_feat, (B, N, K), dtype=jnp.float32)
    # Deterministic Linear(2048, dim) parameters (synthetic, not a checkpoint).
    weight = jax.random.normal(k_w, (DIM, K), dtype=jnp.float32) * 0.02
    bias = jax.random.normal(k_b, (DIM,), dtype=jnp.float32) * 0.02

    w_p, b_p, dim = prepare_params(weight, bias)         # hoisted, one-time
    out = bottom_up_extract(feat, w_p, b_p, dim)
    out = jax.block_until_ready(out)

    ref = _reference(feat, weight, bias)
    assert out.shape == (B, N, DIM)
    assert jnp.allclose(out, ref, atol=2e-5, rtol=2e-5), "mismatch vs reference"

    print("KERNEL_OK")
</pallas_src>

<mosaic_0001>
module attributes {stable_mosaic.version = 11 : i64} {
  func.func @_bottom_up_kernel(%arg0: i32, %arg1: memref<16x2048xf32, #tpu.memory_space<vmem>>, %arg2: memref<2048x128xf32, #tpu.memory_space<vmem>>, %arg3: memref<1x128xf32, #tpu.memory_space<vmem>>, %arg4: memref<16x128xf32, #tpu.memory_space<vmem>>) attributes {dimension_semantics = [#tpu.dimension_semantics<parallel>], iteration_bounds = array<i64: 1>, scalar_prefetch = 0 : i64, scratch_operands = 0 : i64, tpu.core_type = #tpu.core_type<tc>, window_params = [{transform_indices = @transform_0, window_bounds = array<i64: 16, 2048>}, {pipeline_mode = #tpu.pipeline_mode<synchronous>, transform_indices = @transform_1, window_bounds = array<i64: 2048, 128>}, {pipeline_mode = #tpu.pipeline_mode<synchronous>, transform_indices = @transform_2, window_bounds = array<i64: 1, 128>}, {transform_indices = @transform_3, window_bounds = array<i64: 16, 128>}]} {
    %c0 = arith.constant 0 : index
    %c0_0 = arith.constant 0 : index
    %0 = vector.load %arg1[%c0, %c0_0] : memref<16x2048xf32, #tpu.memory_space<vmem>>, vector<16x2048xf32>
    %c0_1 = arith.constant 0 : index
    %c0_2 = arith.constant 0 : index
    %1 = vector.load %arg2[%c0_1, %c0_2] : memref<2048x128xf32, #tpu.memory_space<vmem>>, vector<2048x128xf32>
    %cst = arith.constant dense<0.000000e+00> : vector<16x128xf32>
    %2 = tpu.matmul %0, %1, %cst {dimension_numbers = #tpu.dot_dimension_numbers<[1], [0], [0], [1], [0, 0, 1, 1], [], []>} : vector<16x2048xf32>, vector<2048x128xf32>, vector<16x128xf32> -> vector<16x128xf32>
    %c0_3 = arith.constant 0 : index
    %c0_4 = arith.constant 0 : index
    %3 = vector.load %arg3[%c0_3, %c0_4] : memref<1x128xf32, #tpu.memory_space<vmem>>, vector<1x128xf32>
    %4 = vector.broadcast %3 : vector<1x128xf32> to vector<16x128xf32>
    %5 = arith.addf %2, %4 : vector<16x128xf32>
    %6 = arith.mulf %5, %5 : vector<16x128xf32>
    %cst_5 = arith.constant dense<0.000000e+00> : vector<16xf32>
    %7 = vector.multi_reduction <add>, %6, %cst_5 [1] : vector<16x128xf32> to vector<16xf32>
    %8 = vector.shape_cast %7 : vector<16xf32> to vector<16x1xf32>
    %cst_6 = arith.constant 1.000000e-24 : f32
    %9 = vector.broadcast %cst_6 : f32 to vector<16x1xf32>
    %10 = arith.maximumf %8, %9 : vector<16x1xf32>
    %11 = math.rsqrt %10 : vector<16x1xf32>
    %12 = vector.broadcast %11 : vector<16x1xf32> to vector<16x128xf32>
    %13 = arith.mulf %5, %12 : vector<16x128xf32>
    %c0_7 = arith.constant 0 : index
    %c0_8 = arith.constant 0 : index
    %14 = vector.load %arg4[%c0_7, %c0_8] : memref<16x128xf32, #tpu.memory_space<vmem>>, vector<16x128xf32>
    tpu.vector_store %arg4[%c0_7, %c0_8], %13 {strides = array<i32>} : memref<16x128xf32, #tpu.memory_space<vmem>>, vector<16x128xf32>,
    return
  }
  func.func @transform_0(%arg0: i32) -> (i32, i32) {
    %c0_i32 = arith.constant 0 : i32
    %c0_i32_0 = arith.constant 0 : i32
    return %arg0, %c0_i32 : i32, i32
  }
  func.func @transform_1(%arg0: i32) -> (i32, i32) {
    %c0_i32 = arith.constant 0 : i32
    %c0_i32_0 = arith.constant 0 : i32
    %c0_i32_1 = arith.constant 0 : i32
    return %c0_i32, %c0_i32_0 : i32, i32
  }
  func.func @transform_2(%arg0: i32) -> (i32, i32) {
    %c0_i32 = arith.constant 0 : i32
    %c0_i32_0 = arith.constant 0 : i32
    %c0_i32_1 = arith.constant 0 : i32
    return %c0_i32, %c0_i32_0 : i32, i32
  }
  func.func @transform_3(%arg0: i32) -> (i32, i32) {
    %c0_i32 = arith.constant 0 : i32
    %c0_i32_0 = arith.constant 0 : i32
    return %arg0, %c0_i32 : i32, i32
  }
}

</mosaic_0001>

<bundles_post_ra>
// kernel: bottom_up_extract.1
= control target key start
LH: loop header
LB: loop body
LE: loop exit
PB: predicated region body
PF: predicated region fallthrough
CT: control target
= control target key end

     0   :  { %8 = vsyncpa [#allocation3], 0  ;;  %s1633_s0 = inlined_call_operand.hbm [shape: f32[16,2048], index: 0, kind: input, shape index: {}]   ;;  %s1634_s1 = inlined_call_operand.hbm [shape: f32[2048,128], index: 1, kind: input, shape index: {}]   ;;  %s1635_s2 = inlined_call_operand.vmem [shape: f32[1,128], index: 2, kind: input, shape index: {}]   ;;  %s1636_s3 = inlined_call_operand.vmem [shape: f32[16,128], index: 3, kind: output, shape index: {}]  }
   0x1   :  { %9 = vsyncpa [#allocation5], 0  ;;  %s1575_s12 = smov [#allocation2]   ;;  %s1527_s16 = scalar_lea.hbm %s1633_s0, 4096 }
   0x2   :  { %s15_s13 = sshll.u32 %s1575_s12, 4  ;;  %p1528_p0 = scmp.ne.s32.totalorder %s1633_s0, %s1527_s16  ;;  %s16_s13 = int_to_ptr.vmem [resolvable:$true] %s15_s13 }
   0x3   :  { %p1531_p1 = scmp.lt.u32.totalorder %s1527_s16, %s1633_s0 }
   0x5   :  { %p1533_p2 = pnand %p1531_p1, %p1528_p0 }
   0x7   :  { %1536 = shalt.err (!%p1533_p2)
}
   0x8   :  { %s1537_s21 = scalar_lea.vmem %s16_s13, 4096  ;;  %p1542_p4 = scmp.lt.s32.totalorder %s16_s13, %s16_s13 }
   0x9   :  { %p1538_p3 = scmp.ne.s32.totalorder %s16_s13, %s1537_s21  ;;  %p1543_p5 = scmp.lt.s32.totalorder %s1537_s21, %s1537_s21 }
   0xb   :  { %p1544_p6 = por %p1543_p5, %p1542_p4 }
   0xd   :  { %p1545_p7 = pnand %p1544_p6, %p1538_p3 }
   0xf   :  { %1548 = shalt.err (!%p1545_p7)
}
  0x10   :  { %s1576_s22 = smov 2048   ;;  %s1577_s23 = smov 128  }
  0x11   :  { %21 = dma.hbm_to_vmem [thread:$0]  %s1633_s0, 4096, %s16_s13, [#allocation3], %s1576_s22, %s1576_s22, %s1577_s23  }
  0x12   :  { %s1578_s26 = smov [#allocation4]   ;;  %s1549_s30 = scalar_lea.hbm %s1634_s1, 32768 }
  0x13   :  { %s27_s27 = sshll.u32 %s1578_s26, 4  ;;  %p1550_p8 = scmp.ne.s32.totalorder %s1634_s1, %s1549_s30  ;;  %s28_s27 = int_to_ptr.vmem [resolvable:$true] %s27_s27 }
  0x14   :  { %p1553_p9 = scmp.lt.u32.totalorder %s1549_s30, %s1634_s1 }
  0x16   :  { %p1555_p10 = pnand %p1553_p9, %p1550_p8 }
  0x18   :  { %1558 = shalt.err (!%p1555_p10)
}
  0x19   :  { %s1559_s8 = scalar_lea.vmem %s28_s27, 32768  ;;  %p1564_p12 = scmp.lt.s32.totalorder %s28_s27, %s28_s27 }
  0x1a   :  { %p1560_p11 = scmp.ne.s32.totalorder %s28_s27, %s1559_s8  ;;  %p1565_p13 = scmp.lt.s32.totalorder %s1559_s8, %s1559_s8 }
  0x1c   :  { %p1566_p0 = por %p1565_p13, %p1564_p12 }
  0x1e   :  { %p1567_p1 = pnand %p1566_p0, %p1560_p11 }
  0x20   :  { %1570 = shalt.err (!%p1567_p1)
}
  0x21   :  { %s1579_s0 = smov 8  }
  0x22   :  { %33 = dma.hbm_to_vmem [thread:$0]  %s1634_s1, 32768, %s28_s27, [#allocation5], %s1577_s23, %s1577_s23, %s1579_s0  }
  0x23   :  { %1571 = dma.done.wait [#allocation3], 4096  }
  0x24   :  { %1572 = vsyncadd [#allocation3], 4294963200 }
  0x25   :  { %1573 = dma.done.wait [#allocation5], 32768  }
  0x26   :  { %1574 = vsyncadd [#allocation5], 4294934528  ;;  %v90_v0 = vld [vmem:[#allocation4 + $0x80] sm:$0xff]  ;;  %v91_v1 = vld [vmem:[#allocation4 + $0x88] sm:$0xff] }
  0x27   :  { %v74_v2 = vld [vmem:[#allocation4] sm:$0xff]  ;;  %v1262_v3 = vpack.c.bf16 %v91_v1, %v90_v0  ;;  %v75_v4 = vld [vmem:[#allocation4 + $0x8] sm:$0xff]  ;;  %v92_v11 = vld [vmem:[#allocation4 + $0x90] sm:$0xff] }
  0x28   :  { %v122_v5 = vld [vmem:[#allocation4 + $0x180] sm:$0xff]  ;;  %v123_v6 = vld [vmem:[#allocation4 + $0x188] sm:$0xff]  ;;  %v1264_v7 = vpack.c.bf16 %v75_v4, %v74_v2  ;;  %v93_v13 = vld [vmem:[#allocation4 + $0x98] sm:$0xff] }
  0x29   :  { %v1294_v8 = vpack.c.bf16 %v123_v6, %v122_v5  ;;  %v106_v9 = vld [vmem:[#allocation4 + $0x100] sm:$0xff]  ;;  %v107_v10 = vld [vmem:[#allocation4 + $0x108] sm:$0xff]  ;;  %1263 = vmatprep.subr.bf16.mxu0 %v1262_v3  ;;  %v76_v14 = vld [vmem:[#allocation4 + $0x10] sm:$0xff]  ;;  %v1266_v16 = vpack.c.bf16 %v93_v13, %v92_v11 }
  0x2a   :  { %v1296_v12 = vpack.c.bf16 %v107_v10, %v106_v9  ;;  %v77_v15 = vld [vmem:[#allocation4 + $0x18] sm:$0xff]  ;;  %1265 = vmatpush3.bf16.msra.mxu0 %v1264_v7  ;;  %v124_v18 = vld [vmem:[#allocation4 + $0x190] sm:$0xff]  ;;  %v94_v23 = vld [vmem:[#allocation4 + $0xa0] sm:$0xff] }
  0x2b   :  { %1295 = vmatprep.subr.bf16.mxu1 %v1294_v8  ;;  %v1268_v17 = vpack.c.bf16 %v77_v15, %v76_v14  ;;  %v125_v19 = vld [vmem:[#allocation4 + $0x198] sm:$0xff]  ;;  %v108_v20 = vld [vmem:[#allocation4 + $0x110] sm:$0xff]  ;;  %v95_v24 = vld [vmem:[#allocation4 + $0xa8] sm:$0xff]  ;;  %1267 = vmatprep.subr.bf16.mxu0 %v1266_v16 }
  0x2c   :  { %1297 = vmatpush3.bf16.msra.mxu1 %v1296_v12  ;;  %v1298_v21 = vpack.c.bf16 %v125_v19, %v124_v18  ;;  %v109_v22 = vld [vmem:[#allocation4 + $0x118] sm:$0xff]  ;;  %v1270_v26 = vpack.c.bf16 %v95_v24, %v94_v23  ;;  %v78_v27 = vld [vmem:[#allocation4 + $0x20] sm:$0xff]  ;;  %v79_v28 = vld [vmem:[#allocation4 + $0x28] sm:$0xff] }
  0x2d   :  { %v1300_v25 = vpack.c.bf16 %v109_v22, %v108_v20  ;;  %v126_v29 = vld [vmem:[#allocation4 + $0x1a0] sm:$0xff]  ;;  %v127_v30 = vld [vmem:[#allocation4 + $0x1a8] sm:$0xff]  ;;  %v1272_v33 = vpack.c.bf16 %v79_v28, %v78_v27  ;;  %v96_v35 = vld [vmem:[#allocation4 + $0xb0] sm:$0xff] }
  0x2e   :  { %1299 = vmatprep.subr.bf16.mxu1 %v1298_v21  ;;  %v110_v31 = vld [vmem:[#allocation4 + $0x120] sm:$0xff]  ;;  %v111_v32 = vld [vmem:[#allocation4 + $0x128] sm:$0xff]  ;;  %1269 = vmatpush3.bf16.msra.mxu0 %v1268_v17  ;;  %v1302_v34 = vpack.c.bf16 %v127_v30, %v126_v29  ;;  %v97_v36 = vld [vmem:[#allocation4 + $0xb8] sm:$0xff] }
  0x2f   :  { %v80_v37 = vld [vmem:[#allocation4 + $0x30] sm:$0xff]  ;;  %1271 = vmatprep.subr.bf16.mxu0 %v1270_v26  ;;  %v1304_v38 = vpack.c.bf16 %v111_v32, %v110_v31  ;;  %v1274_v39 = vpack.c.bf16 %v97_v36, %v96_v35  ;;  %v81_v40 = vld [vmem:[#allocation4 + $0x38] sm:$0xff]  ;;  %v98_v46 = vld [vmem:[#allocation4 + $0xc0] sm:$0xff] }
  0x30   :  { %1301 = vmatpush3.bf16.msra.mxu1 %v1300_v25  ;;  %v128_v41 = vld [vmem:[#allocation4 + $0x1b0] sm:$0xff]  ;;  %v129_v42 = vld [vmem:[#allocation4 + $0x1b8] sm:$0xff]  ;;  %v99_v47 = vld [vmem:[#allocation4 + $0xc8] sm:$0xff]  ;;  %v1276_v48 = vpack.c.bf16 %v81_v40, %v80_v37 }
  0x31   :  { %1303 = vmatprep.subr.bf16.mxu1 %v1302_v34  ;;  %v1306_v43 = vpack.c.bf16 %v129_v42, %v128_v41  ;;  %v112_v44 = vld [vmem:[#allocation4 + $0x130] sm:$0xff]  ;;  %v113_v45 = vld [vmem:[#allocation4 + $0x138] sm:$0xff]  ;;  %v130_v49 = vld [vmem:[#allocation4 + $0x1c0] sm:$0xff]  ;;  %v1278_v52 = vpack.c.bf16 %v99_v47, %v98_v46 }
  0x32   :  { %1273 = vmatpush3.bf16.msra.mxu0 %v1272_v33  ;;  %v131_v50 = vld [vmem:[#allocation4 + $0x1c8] sm:$0xff]  ;;  %v1308_v51 = vpack.c.bf16 %v113_v45, %v112_v44  ;;  %v82_v53 = vld [vmem:[#allocation4 + $0x40] sm:$0xff]  ;;  %v100_v58 = vld [vmem:[#allocation4 + $0xd0] sm:$0xff] }
  0x33   :  { %1275 = vmatprep.subr.bf16.mxu0 %v1274_v39  ;;  %v83_v54 = vld [vmem:[#allocation4 + $0x48] sm:$0xff]  ;;  %v114_v55 = vld [vmem:[#allocation4 + $0x140] sm:$0xff]  ;;  %v1310_v56 = vpack.c.bf16 %v131_v50, %v130_v49  ;;  %v101_v59 = vld [vmem:[#allocation4 + $0xd8] sm:$0xff] }
  0x34   :  { %1305 = vmatpush3.bf16.msra.mxu1 %v1304_v38  ;;  %v115_v57 = vld [vmem:[#allocation4 + $0x148] sm:$0xff]  ;;  %v132_v60 = vld [vmem:[#allocation4 + $0x1d0] sm:$0xff]  ;;  %v133_v61 = vld [vmem:[#allocation4 + $0x1d8] sm:$0xff]  ;;  %v1280_v62 = vpack.c.bf16 %v83_v54, %v82_v53  ;;  %v1282_v0 = vpack.c.bf16 %v101_v59, %v100_v58 }
  0x35   :  { %1307 = vmatprep.subr.bf16.mxu1 %v1306_v43  ;;  %v1312_v63 = vpack.c.bf16 %v115_v57, %v114_v55  ;;  %v84_v1 = vld [vmem:[#allocation4 + $0x50] sm:$0xff]  ;;  %v85_v2 = vld [vmem:[#allocation4 + $0x58] sm:$0xff]  ;;  %v1314_v4 = vpack.c.bf16 %v133_v61, %v132_v60  ;;  %v102_v6 = vld [vmem:[#allocation4 + $0xe0] sm:$0xff] }
  0x36   :  { %1277 = vmatpush3.bf16.msra.mxu0 %v1276_v48  ;;  %v116_v3 = vld [vmem:[#allocation4 + $0x150] sm:$0xff]  ;;  %v117_v5 = vld [vmem:[#allocation4 + $0x158] sm:$0xff]  ;;  %v103_v7 = vld [vmem:[#allocation4 + $0xe8] sm:$0xff]  ;;  %v1284_v10 = vpack.c.bf16 %v85_v2, %v84_v1 }
  0x37   :  { %1279 = vmatprep.subr.bf16.mxu0 %v1278_v52  ;;  %v134_v8 = vld [vmem:[#allocation4 + $0x1e0] sm:$0xff]  ;;  %v135_v9 = vld [vmem:[#allocation4 + $0x1e8] sm:$0xff]  ;;  %v1316_v13 = vpack.c.bf16 %v117_v5, %v116_v3  ;;  %v1286_v14 = vpack.c.bf16 %v103_v7, %v102_v6  ;;  %v104_v19 = vld [vmem:[#allocation4 + $0xf0] sm:$0xff] }
  0x38   :  { %1309 = vmatpush3.bf16.msra.mxu1 %v1308_v51  ;;  %v86_v11 = vld [vmem:[#allocation4 + $0x60] sm:$0xff]  ;;  %v87_v12 = vld [vmem:[#allocation4 + $0x68] sm:$0xff]  ;;  %v1318_v18 = vpack.c.bf16 %v135_v9, %v134_v8  ;;  %v105_v20 = vld [vmem:[#allocation4 + $0xf8] sm:$0xff] }
  0x39   :  { %1311 = vmatprep.subr.bf16.mxu1 %v1310_v56  ;;  %v118_v15 = vld [vmem:[#allocation4 + $0x160] sm:$0xff]  ;;  %v119_v16 = vld [vmem:[#allocation4 + $0x168] sm:$0xff]  ;;  %v45_v21 = vld [vmem:[#allocation2 + $0x18] sm:$0xff]  ;;  %v1288_v24 = vpack.c.bf16 %v87_v12, %v86_v11  ;;  %v1290_v26 = vpack.c.bf16 %v105_v20, %v104_v19 }
  0x3a   :  { %1281 = vmatpush3.bf16.msra.mxu0 %v1280_v62  ;;  %v43_v17 = vld [vmem:[#allocation2 + $0x8] sm:$0xff]  ;;  %v136_v22 = vld [vmem:[#allocation4 + $0x1f0] sm:$0xff]  ;;  %v137_v23 = vld [vmem:[#allocation4 + $0x1f8] sm:$0xff]  ;;  %476 = vmatprep.mubr.f32.mxu1 %v45_v21  ;;  %v1320_v25 = vpack.c.bf16 %v119_v16, %v118_v15 }
  0x3b   :  { %1283 = vmatprep.subr.bf16.mxu0 %v1282_v0  ;;  %401 = vmatprep.mubr.f32.mxu0 %v43_v17  ;;  %v88_v27 = vld [vmem:[#allocation4 + $0x70] sm:$0xff]  ;;  %v89_v28 = vld [vmem:[#allocation4 + $0x78] sm:$0xff]  ;;  %v1322_v30 = vpack.c.bf16 %v137_v23, %v136_v22  ;;  %v154_v32 = vld [vmem:[#allocation4 + $0x280] sm:$0xff] }
  0x3c   :  { %1313 = vmatpush3.bf16.msra.mxu1 %v1312_v63  ;;  %v120_v29 = vld [vmem:[#allocation4 + $0x170] sm:$0xff]  ;;  %v121_v31 = vld [vmem:[#allocation4 + $0x178] sm:$0xff]  ;;  %v155_v33 = vld [vmem:[#allocation4 + $0x288] sm:$0xff]  ;;  %v1292_v36 = vpack.c.bf16 %v89_v28, %v88_v27 }
  0x3d   :  { %1315 = vmatprep.subr.bf16.mxu1 %v1314_v4  ;;  %v186_v34 = vld [vmem:[#allocation4 + $0x380] sm:$0xff]  ;;  %v187_v35 = vld [vmem:[#allocation4 + $0x388] sm:$0xff]  ;;  %v1324_v37 = vpack.c.bf16 %v121_v31, %v120_v29  ;;  %v1326_v38 = vpack.c.bf16 %v155_v33, %v154_v32  ;;  %v156_v44 = vld [vmem:[#allocation4 + $0x290] sm:$0xff] }
  0x3e   :  { %1285 = vmatpush3.bf16.msra.mxu0 %v1284_v10  ;;  %v138_v39 = vld [vmem:[#allocation4 + $0x200] sm:$0xff]  ;;  %v139_v40 = vld [vmem:[#allocation4 + $0x208] sm:$0xff]  ;;  %v1358_v42 = vpack.c.bf16 %v187_v35, %v186_v34  ;;  %v157_v45 = vld [vmem:[#allocation4 + $0x298] sm:$0xff] }
  0x3f   :  { %1287 = vmatprep.subr.bf16.mxu0 %v1286_v14  ;;  %v170_v41 = vld [vmem:[#allocation4 + $0x300] sm:$0xff]  ;;  %v171_v43 = vld [vmem:[#allocation4 + $0x308] sm:$0xff]  ;;  %v188_v46 = vld [vmem:[#allocation4 + $0x390] sm:$0xff]  ;;  %v1328_v49 = vpack.c.bf16 %v139_v40, %v138_v39  ;;  %v1330_v52 = vpack.c.bf16 %v157_v45, %v156_v44 }
  0x40   :  { %1317 = vmatpush3.bf16.msra.mxu1 %v1316_v13  ;;  %v189_v47 = vld [vmem:[#allocation4 + $0x398] sm:$0xff]  ;;  %v42_v48 = vld [vmem:[#allocation2] sm:$0xff]  ;;  %v44_v50 = vld [vmem:[#allocation2 + $0x10] sm:$0xff]  ;;  %v1360_v51 = vpack.c.bf16 %v171_v43, %v170_v41 }
  0x41   :  { %1319 = vmatprep.subr.bf16.mxu1 %v1318_v18  ;;  %v140_v53 = vld [vmem:[#allocation4 + $0x210] sm:$0xff]  ;;  %v141_v54 = vld [vmem:[#allocation4 + $0x218] sm:$0xff]  ;;  %v1362_v56 = vpack.c.bf16 %v189_v47, %v188_v46  ;;  %v158_v58 = vld [vmem:[#allocation4 + $0x2a0] sm:$0xff] }
  0x42   :  { %1289 = vmatpush3.bf16.msra.mxu0 %v1288_v24  ;;  %v172_v55 = vld [vmem:[#allocation4 + $0x310] sm:$0xff]  ;;  %v173_v57 = vld [vmem:[#allocation4 + $0x318] sm:$0xff]  ;;  %v159_v59 = vld [vmem:[#allocation4 + $0x2a8] sm:$0xff]  ;;  %v1332_v62 = vpack.c.bf16 %v141_v54, %v140_v53 }
  0x43   :  { %1291 = vmatprep.subr.bf16.mxu0 %v1290_v26  ;;  %v190_v60 = vld [vmem:[#allocation4 + $0x3a0] sm:$0xff]  ;;  %v191_v61 = vld [vmem:[#allocation4 + $0x3a8] sm:$0xff]  ;;  %v1364_v63 = vpack.c.bf16 %v173_v57, %v172_v55  ;;  %v1334_v0 = vpack.c.bf16 %v159_v59, %v158_v58  ;;  %v160_v6 = vld [vmem:[#allocation4 + $0x2b0] sm:$0xff] }
  0x44   :  { %1321 = vmatpush3.bf16.msra.mxu1 %v1320_v25  ;;  %v142_v1 = vld [vmem:[#allocation4 + $0x220] sm:$0xff]  ;;  %v143_v2 = vld [vmem:[#allocation4 + $0x228] sm:$0xff]  ;;  %v1366_v4 = vpack.c.bf16 %v191_v61, %v190_v60  ;;  %v161_v7 = vld [vmem:[#allocation4 + $0x2b8] sm:$0xff] }
  0x45   :  { %1323 = vmatprep.subr.bf16.mxu1 %v1322_v30  ;;  %v174_v3 = vld [vmem:[#allocation4 + $0x320] sm:$0xff]  ;;  %v175_v5 = vld [vmem:[#allocation4 + $0x328] sm:$0xff]  ;;  %v192_v8 = vld [vmem:[#allocation4 + $0x3b0] sm:$0xff]  ;;  %v1336_v10 = vpack.c.bf16 %v143_v2, %v142_v1  ;;  %v1338_v15 = vpack.c.bf16 %v161_v7, %v160_v6 }
  0x46   :  { %1293 = vmatpush3.bf16.msra.mxu0 %v1292_v36  ;;  %v193_v9 = vld [vmem:[#allocation4 + $0x3b8] sm:$0xff]  ;;  %v144_v11 = vld [vmem:[#allocation4 + $0x230] sm:$0xff]  ;;  %v1368_v14 = vpack.c.bf16 %v175_v5, %v174_v3  ;;  %v59_v17 = vld [vmem:[#allocation2 + $0x88] sm:$0xff] }
  0x47   :  { %1327 = vmatprep.subr.bf16.mxu0 %v1326_v38  ;;  %v145_v12 = vld [vmem:[#allocation4 + $0x238] sm:$0xff]  ;;  %v176_v13 = vld [vmem:[#allocation4 + $0x330] sm:$0xff]  ;;  %v58_v18 = vld [vmem:[#allocation2 + $0x80] sm:$0xff]  ;;  %v1370_v19 = vpack.c.bf16 %v193_v9, %v192_v8 }
  0x48   :  { %1325 = vmatpush3.bf16.msra.mxu1 %v1324_v37  ;;  %v177_v16 = vld [vmem:[#allocation4 + $0x338] sm:$0xff]  ;;  %v162_v20 = vld [vmem:[#allocation4 + $0x2c0] sm:$0xff]  ;;  %v163_v21 = vld [vmem:[#allocation4 + $0x2c8] sm:$0xff]  ;;  %v1340_v25 = vpack.c.bf16 %v145_v12, %v144_v11 }
  0x49   :  { %1359 = vmatprep.subr.bf16.mxu1 %v1358_v42  ;;  %402 = vmatmul.mubr.f32.vlgmr.msra.gmra.mrb[0].mxu0 %v42_v48  ;;  %v61_v22 = vld [vmem:[#allocation2 + $0x98] sm:$0xff]  ;;  %v194_v23 = vld [vmem:[#allocation4 + $0x3c0] sm:$0xff]  ;;  %v195_v24 = vld [vmem:[#allocation4 + $0x3c8] sm:$0xff]  ;;  %v1372_v29 = vpack.c.bf16 %v177_v16, %v176_v13  ;;  %v1342_v30 = vpack.c.bf16 %v163_v21, %v162_v20 }
  0x4a   :  { %1329 = vmatpush3.bf16.msra.mxu0 %v1328_v49  ;;  %406 = vmatprep.mubr.f32.mxu0 %v59_v17  ;;  %v146_v26 = vld [vmem:[#allocation4 + $0x240] sm:$0xff]  ;;  %v147_v27 = vld [vmem:[#allocation4 + $0x248] sm:$0xff]  ;;  %v60_v28 = vld [vmem:[#allocation2 + $0x90] sm:$0xff]  ;;  %v1374_v34 = vpack.c.bf16 %v195_v24, %v194_v23 }
  0x4b   :  { %477 = vmatmul.mubr.f32.vlgmr.msra.gmra.mrb[0].mxu1 %v44_v50  ;;  %1331 = vmatprep.subr.bf16.mxu0 %v1330_v52  ;;  %v178_v31 = vld [vmem:[#allocation4 + $0x340] sm:$0xff]  ;;  %v179_v32 = vld [vmem:[#allocation4 + $0x348] sm:$0xff]  ;;  %v164_v35 = vld [vmem:[#allocation4 + $0x2d0] sm:$0xff]  ;;  %v1344_v40 = vpack.c.bf16 %v147_v27, %v146_v26 }
  0x4c   :  { %1361 = vmatpush3.bf16.msra.mxu1 %v1360_v51  ;;  %481 = vmatprep.mubr.f32.mxu1 %v61_v22  ;;  %v47_v33 = vld [vmem:[#allocation2 + $0x28] sm:$0xff]  ;;  %v165_v36 = vld [vmem:[#allocation4 + $0x2d8] sm:$0xff]  ;;  %v196_v38 = vld [vmem:[#allocation4 + $0x3d0] sm:$0xff]  ;;  %v1376_v41 = vpack.c.bf16 %v179_v32, %v178_v31 }
  0x4d   :  { %1363 = vmatprep.subr.bf16.mxu1 %v1362_v56  ;;  %407 = vmatmul.mubr.f32.gmra.mrb[2].mxu0 %v58_v18  ;;  %v49_v37 = vld [vmem:[#allocation2 + $0x38] sm:$0xff]  ;;  %v1346_v42 = vpack.c.bf16 %v165_v36, %v164_v35  ;;  %v148_v43 = vld [vmem:[#allocation4 + $0x250] sm:$0xff]  ;;  %v166_v48 = vld [vmem:[#allocation4 + $0x2e0] sm:$0xff] }
  0x4e   :  { %1333 = vmatpush3.bf16.msra.mxu0 %v1332_v62  ;;  %v197_v39 = vld [vmem:[#allocation4 + $0x3d8] sm:$0xff]  ;;  %551 = vmatprep.mubr.f32.mxu0 %v47_v33  ;;  %v180_v45 = vld [vmem:[#allocation4 + $0x350] sm:$0xff]  ;;  %v167_v49 = vld [vmem:[#allocation4 + $0x2e8] sm:$0xff] }
  0x4f   :  { %1335 = vmatprep.subr.bf16.mxu0 %v1334_v0  ;;  %482 = vmatmul.mubr.f32.gmra.mrb[2].mxu1 %v60_v28  ;;  %v149_v44 = vld [vmem:[#allocation4 + $0x258] sm:$0xff]  ;;  %v1378_v46 = vpack.c.bf16 %v197_v39, %v196_v38  ;;  %v198_v50 = vld [vmem:[#allocation4 + $0x3e0] sm:$0xff]  ;;  %v199_v51 = vld [vmem:[#allocation4 + $0x3e8] sm:$0xff]  ;;  %v1350_v54 = vpack.c.bf16 %v167_v49, %v166_v48 }
  0x50   :  { %1365 = vmatpush3.bf16.msra.mxu1 %v1364_v63  ;;  %626 = vmatprep.mubr.f32.mxu1 %v49_v37  ;;  %v181_v47 = vld [vmem:[#allocation4 + $0x358] sm:$0xff]  ;;  %v1348_v52 = vpack.c.bf16 %v149_v44, %v148_v43  ;;  %v150_v55 = vld [vmem:[#allocation4 + $0x260] sm:$0xff]  ;;  %v151_v56 = vld [vmem:[#allocation4 + $0x268] sm:$0xff]  ;;  %v1382_v58 = vpack.c.bf16 %v199_v51, %v198_v50 }
  0x51   :  { %1367 = vmatprep.subr.bf16.mxu1 %v1366_v4  ;;  %v1380_v53 = vpack.c.bf16 %v181_v47, %v180_v45  ;;  %v182_v57 = vld [vmem:[#allocation4 + $0x360] sm:$0xff]  ;;  %v183_v59 = vld [vmem:[#allocation4 + $0x368] sm:$0xff]  ;;  %v168_v60 = vld [vmem:[#allocation4 + $0x2f0] sm:$0xff]  ;;  %v1352_v0 = vpack.c.bf16 %v151_v56, %v150_v55 }
  0x52   :  { %1337 = vmatpush3.bf16.msra.mxu0 %v1336_v10  ;;  %v169_v61 = vld [vmem:[#allocation4 + $0x2f8] sm:$0xff]  ;;  %v200_v62 = vld [vmem:[#allocation4 + $0x3f0] sm:$0xff]  ;;  %v1384_v1 = vpack.c.bf16 %v183_v59, %v182_v57  ;;  %v218_v8 = vld [vmem:[#allocation4 + $0x480] sm:$0xff] }
  0x53   :  { %1339 = vmatprep.subr.bf16.mxu0 %v1338_v15  ;;  %v201_v63 = vld [vmem:[#allocation4 + $0x3f8] sm:$0xff]  ;;  %v1354_v2 = vpack.c.bf16 %v169_v61, %v168_v60  ;;  %v152_v3 = vld [vmem:[#allocation4 + $0x270] sm:$0xff]  ;;  %v219_v9 = vld [vmem:[#allocation4 + $0x488] sm:$0xff] }
  0x54   :  { %1369 = vmatpush3.bf16.msra.mxu1 %v1368_v14  ;;  %v153_v4 = vld [vmem:[#allocation4 + $0x278] sm:$0xff]  ;;  %v184_v5 = vld [vmem:[#allocation4 + $0x370] sm:$0xff]  ;;  %v1386_v6 = vpack.c.bf16 %v201_v63, %v200_v62  ;;  %v250_v10 = vld [vmem:[#allocation4 + $0x580] sm:$0xff]  ;;  %v1390_v14 = vpack.c.bf16 %v219_v9, %v218_v8 }
  0x55   :  { %1371 = vmatprep.subr.bf16.mxu1 %v1370_v19  ;;  %v185_v7 = vld [vmem:[#allocation4 + $0x378] sm:$0xff]  ;;  %v251_v11 = vld [vmem:[#allocation4 + $0x588] sm:$0xff]  ;;  %v1356_v12 = vpack.c.bf16 %v153_v4, %v152_v3  ;;  %v202_v15 = vld [vmem:[#allocation4 + $0x400] sm:$0xff] }
  0x56   :  { %1341 = vmatpush3.bf16.msra.mxu0 %v1340_v25  ;;  %v1388_v13 = vpack.c.bf16 %v185_v7, %v184_v5  ;;  %v203_v16 = vld [vmem:[#allocation4 + $0x408] sm:$0xff]  ;;  %v46_v17 = vld [vmem:[#allocation2 + $0x20] sm:$0xff]  ;;  %v1422_v18 = vpack.c.bf16 %v251_v11, %v250_v10  ;;  %v48_v21 = vld [vmem:[#allocation2 + $0x30] sm:$0xff] }
  0x57   :  { %1343 = vmatprep.subr.bf16.mxu0 %v1342_v30  ;;  %v234_v19 = vld [vmem:[#allocation4 + $0x500] sm:$0xff]  ;;  %v235_v20 = vld [vmem:[#allocation4 + $0x508] sm:$0xff]  ;;  %v220_v22 = vld [vmem:[#allocation4 + $0x490] sm:$0xff]  ;;  %v1392_v24 = vpack.c.bf16 %v203_v16, %v202_v15 }
  0x58   :  { %1373 = vmatpush3.bf16.msra.mxu1 %v1372_v29  ;;  %v221_v23 = vld [vmem:[#allocation4 + $0x498] sm:$0xff]  ;;  %v63_v25 = vld [vmem:[#allocation2 + $0xa8] sm:$0xff]  ;;  %v252_v26 = vld [vmem:[#allocation4 + $0x590] sm:$0xff]  ;;  %v1424_v28 = vpack.c.bf16 %v235_v20, %v234_v19 }
  0x59   :  { %1375 = vmatprep.subr.bf16.mxu1 %v1374_v34  ;;  %v253_v27 = vld [vmem:[#allocation4 + $0x598] sm:$0xff]  ;;  %v204_v29 = vld [vmem:[#allocation4 + $0x410] sm:$0xff]  ;;  %v1394_v32 = vpack.c.bf16 %v221_v23, %v220_v22  ;;  %v222_v34 = vld [vmem:[#allocation4 + $0x4a0] sm:$0xff] }
  0x5a   :  { %1345 = vmatpush3.bf16.msra.mxu0 %v1344_v40  ;;  %v205_v30 = vld [vmem:[#allocation4 + $0x418] sm:$0xff]  ;;  %v236_v31 = vld [vmem:[#allocation4 + $0x510] sm:$0xff]  ;;  %v223_v35 = vld [vmem:[#allocation4 + $0x4a8] sm:$0xff]  ;;  %v1426_v37 = vpack.c.bf16 %v253_v27, %v252_v26 }
  0x5b   :  { %1347 = vmatprep.subr.bf16.mxu0 %v1346_v42  ;;  %v237_v33 = vld [vmem:[#allocation4 + $0x518] sm:$0xff]  ;;  %v254_v38 = vld [vmem:[#allocation4 + $0x5a0] sm:$0xff]  ;;  %v255_v39 = vld [vmem:[#allocation4 + $0x5a8] sm:$0xff]  ;;  %v1398_v44 = vpack.c.bf16 %v223_v35, %v222_v34 }
  0x5c   :  { %1377 = vmatpush3.bf16.msra.mxu1 %v1376_v41  ;;  %v65_v36 = vld [vmem:[#allocation2 + $0xb8] sm:$0xff]  ;;  %v62_v40 = vld [vmem:[#allocation2 + $0xa0] sm:$0xff]  ;;  %v1396_v41 = vpack.c.bf16 %v205_v30, %v204_v29  ;;  %v64_v42 = vld [vmem:[#allocation2 + $0xb0] sm:$0xff]  ;;  %v1428_v43 = vpack.c.bf16 %v237_v33, %v236_v31  ;;  %v1430_v48 = vpack.c.bf16 %v255_v39, %v254_v38 }
  0x5d   :  { %1379 = vmatprep.subr.bf16.mxu1 %v1378_v46  ;;  %v206_v45 = vld [vmem:[#allocation4 + $0x420] sm:$0xff]  ;;  %v207_v46 = vld [vmem:[#allocation4 + $0x428] sm:$0xff]  ;;  %v224_v50 = vld [vmem:[#allocation4 + $0x4b0] sm:$0xff] }
  0x5e   :  { %1349 = vmatpush3.bf16.msra.mxu0 %v1348_v52  ;;  %v238_v47 = vld [vmem:[#allocation4 + $0x520] sm:$0xff]  ;;  %v239_v49 = vld [vmem:[#allocation4 + $0x528] sm:$0xff]  ;;  %v225_v51 = vld [vmem:[#allocation4 + $0x4b8] sm:$0xff]  ;;  %v1400_v55 = vpack.c.bf16 %v207_v46, %v206_v45 }
  0x5f   :  { %1351 = vmatprep.subr.bf16.mxu0 %v1350_v54  ;;  %v256_v52 = vld [vmem:[#allocation4 + $0x5b0] sm:$0xff]  ;;  %v51_v54 = vld [vmem:[#allocation2 + $0x48] sm:$0xff]  ;;  %v53_v56 = vld [vmem:[#allocation2 + $0x58] sm:$0xff]  ;;  %v1432_v57 = vpack.c.bf16 %v239_v49, %v238_v47 }
  0x60   :  { %1381 = vmatpush3.bf16.msra.mxu1 %v1380_v53  ;;  %v257_v53 = vld [vmem:[#allocation4 + $0x5b8] sm:$0xff]  ;;  %v208_v59 = vld [vmem:[#allocation4 + $0x430] sm:$0xff]  ;;  %v259_v3 = vld [vmem:[#allocation4 + $0x5c8] sm:$0xff] }
  0x61   :  { %1383 = vmatprep.subr.bf16.mxu1 %v1382_v58  ;;  %v1402_v58 = vpack.c.bf16 %v225_v51, %v224_v50  ;;  %v209_v60 = vld [vmem:[#allocation4 + $0x438] sm:$0xff]  ;;  %v240_v61 = vld [vmem:[#allocation4 + $0x530] sm:$0xff]  ;;  %v1434_v62 = vpack.c.bf16 %v257_v53, %v256_v52  ;;  %v210_v7 = vld [vmem:[#allocation4 + $0x440] sm:$0xff] }
  0x62   :  { %1353 = vmatpush3.bf16.msra.mxu0 %v1352_v0  ;;  %v241_v63 = vld [vmem:[#allocation4 + $0x538] sm:$0xff]  ;;  %v226_v0 = vld [vmem:[#allocation4 + $0x4c0] sm:$0xff]  ;;  %v1404_v4 = vpack.c.bf16 %v209_v60, %v208_v59  ;;  %v211_v8 = vld [vmem:[#allocation4 + $0x448] sm:$0xff] }
  0x63   :  { %1355 = vmatprep.subr.bf16.mxu0 %v1354_v2  ;;  %v258_v2 = vld [vmem:[#allocation4 + $0x5c0] sm:$0xff]  ;;  %v1436_v5 = vpack.c.bf16 %v241_v63, %v240_v61  ;;  %v243_v11 = vld [vmem:[#allocation4 + $0x548] sm:$0xff]  ;;  %v261_v15 = vld [vmem:[#allocation4 + $0x5d8] sm:$0xff]  ;;  %v1408_v16 = vpack.c.bf16 %v211_v8, %v210_v7 }
  0x64   :  { %1385 = vmatpush3.bf16.msra.mxu1 %v1384_v1  ;;  %v227_v1 = vld [vmem:[#allocation4 + $0x4c8] sm:$0xff]  ;;  %v242_v9 = vld [vmem:[#allocation4 + $0x540] sm:$0xff]  ;;  %v1438_v10 = vpack.c.bf16 %v259_v3, %v258_v2  ;;  %v212_v19 = vld [vmem:[#allocation4 + $0x450] sm:$0xff] }
  0x65   :  { %1387 = vmatprep.subr.bf16.mxu1 %v1386_v6  ;;  %v1406_v6 = vpack.c.bf16 %v227_v1, %v226_v0  ;;  %v213_v20 = vld [vmem:[#allocation4 + $0x458] sm:$0xff]  ;;  %v262_v26 = vld [vmem:[#allocation4 + $0x5e0] sm:$0xff]  ;;  %v263_v27 = vld [vmem:[#allocation4 + $0x5e8] sm:$0xff] }
  0x66   :  { %1357 = vmatpush3.bf16.msra.mxu0 %v1356_v12  ;;  %v228_v12 = vld [vmem:[#allocation4 + $0x4d0] sm:$0xff]  ;;  %v245_v23 = vld [vmem:[#allocation4 + $0x558] sm:$0xff]  ;;  %v214_v31 = vld [vmem:[#allocation4 + $0x460] sm:$0xff]  ;;  %v1446_v34 = vpack.c.bf16 %v263_v27, %v262_v26 }
  0x67   :  { %1391 = vmatprep.subr.bf16.mxu0 %v1390_v14  ;;  %v260_v14 = vld [vmem:[#allocation4 + $0x5d0] sm:$0xff]  ;;  %v246_v33 = vld [vmem:[#allocation4 + $0x560] sm:$0xff]  ;;  %v247_v35 = vld [vmem:[#allocation4 + $0x568] sm:$0xff] }
  0x68   :  { %1389 = vmatpush3.bf16.msra.mxu1 %v1388_v13  ;;  %v229_v13 = vld [vmem:[#allocation4 + $0x4d8] sm:$0xff]  ;;  %v1442_v22 = vpack.c.bf16 %v261_v15, %v260_v14  ;;  %v264_v38 = vld [vmem:[#allocation4 + $0x5f0] sm:$0xff]  ;;  %v283_v49 = vld [vmem:[#allocation4 + $0x688] sm:$0xff] }
  0x69   :  { %1423 = vmatprep.subr.bf16.mxu1 %v1422_v18  ;;  %552 = vmatmul.mubr.f32.vlgmr.msra.gmra.mrb[4].mxu0 %v46_v17  ;;  %v1440_v17 = vpack.c.bf16 %v243_v11, %v242_v9  ;;  %v1410_v18 = vpack.c.bf16 %v229_v13, %v228_v12  ;;  %v265_v39 = vld [vmem:[#allocation4 + $0x5f8] sm:$0xff]  ;;  %v248_v45 = vld [vmem:[#allocation4 + $0x570] sm:$0xff]  ;;  %v314_v50 = vld [vmem:[#allocation4 + $0x780] sm:$0xff] }
  0x6a   :  { %1393 = vmatpush3.bf16.msra.mxu0 %v1392_v24  ;;  %556 = vmatprep.mubr.f32.mxu0 %v63_v25  ;;  %v230_v24 = vld [vmem:[#allocation4 + $0x4e0] sm:$0xff]  ;;  %v231_v25 = vld [vmem:[#allocation4 + $0x4e8] sm:$0xff]  ;;  %v1450_v46 = vpack.c.bf16 %v265_v39, %v264_v38  ;;  %v249_v47 = vld [vmem:[#allocation4 + $0x578] sm:$0xff] }
  0x6b   :  { %627 = vmatmul.mubr.f32.vlgmr.msra.gmra.mrb[4].mxu1 %v48_v21  ;;  %1395 = vmatprep.subr.bf16.mxu0 %v1394_v32  ;;  %v244_v21 = vld [vmem:[#allocation4 + $0x550] sm:$0xff]  ;;  %v1414_v30 = vpack.c.bf16 %v231_v25, %v230_v24  ;;  %v215_v32 = vld [vmem:[#allocation4 + $0x468] sm:$0xff]  ;;  %v1452_v53 = vpack.c.bf16 %v249_v47, %v248_v45  ;;  %v298_v59 = vld [vmem:[#allocation4 + $0x700] sm:$0xff] }
  0x6c   :  { %1425 = vmatpush3.bf16.msra.mxu1 %v1424_v28  ;;  %631 = vmatprep.mubr.f32.mxu1 %v65_v36  ;;  %v1412_v28 = vpack.c.bf16 %v213_v20, %v212_v19  ;;  %v1444_v29 = vpack.c.bf16 %v245_v23, %v244_v21  ;;  %v232_v36 = vld [vmem:[#allocation4 + $0x4f0] sm:$0xff]  ;;  %v315_v51 = vld [vmem:[#allocation4 + $0x788] sm:$0xff]  ;;  %v285_v63 = vld [vmem:[#allocation4 + $0x698] sm:$0xff] }
  0x6d   :  { %557 = vmatmul.mubr.f32.gmra.mrb[6].mxu0 %v62_v40  ;;  %1427 = vmatprep.subr.bf16.mxu1 %v1426_v37  ;;  %v233_v37 = vld [vmem:[#allocation4 + $0x4f8] sm:$0xff]  ;;  %v1416_v40 = vpack.c.bf16 %v215_v32, %v214_v31  ;;  %v299_v60 = vld [vmem:[#allocation4 + $0x708] sm:$0xff]  ;;  %v52_v61 = vld [vmem:[#allocation2 + $0x50] sm:$0xff] }
  0x6e   :  { %1397 = vmatpush3.bf16.msra.mxu0 %v1396_v41  ;;  %701 = vmatprep.mubr.f32.mxu0 %v51_v54  ;;  %v1448_v41 = vpack.c.bf16 %v247_v35, %v246_v33  ;;  %v67_v1 = vld [vmem:[#allocation2 + $0xc8] sm:$0xff]  ;;  %v316_v2 = vld [vmem:[#allocation4 + $0x790] sm:$0xff]  ;;  %v317_v3 = vld [vmem:[#allocation4 + $0x798] sm:$0xff] }
  0x6f   :  { %632 = vmatmul.mubr.f32.gmra.mrb[6].mxu1 %v64_v42  ;;  %1399 = vmatprep.subr.bf16.mxu0 %v1398_v44  ;;  %v1418_v42 = vpack.c.bf16 %v233_v37, %v232_v36  ;;  %v217_v44 = vld [vmem:[#allocation4 + $0x478] sm:$0xff]  ;;  %v300_v7 = vld [vmem:[#allocation4 + $0x710] sm:$0xff]  ;;  %v287_v11 = vld [vmem:[#allocation4 + $0x6a8] sm:$0xff]  ;;  %v1490_v13 = vpack.c.bf16 %v317_v3, %v316_v2 }
  0x70   :  { %1429 = vmatpush3.bf16.msra.mxu1 %v1428_v43  ;;  %776 = vmatprep.mubr.f32.mxu1 %v53_v56  ;;  %v216_v43 = vld [vmem:[#allocation4 + $0x470] sm:$0xff]  ;;  %v267_v56 = vld [vmem:[#allocation4 + $0x608] sm:$0xff]  ;;  %v301_v9 = vld [vmem:[#allocation4 + $0x718] sm:$0xff] }
  0x71   :  { %1431 = vmatprep.subr.bf16.mxu1 %v1430_v48  ;;  %v282_v48 = vld [vmem:[#allocation4 + $0x680] sm:$0xff]  ;;  %v1420_v52 = vpack.c.bf16 %v217_v44, %v216_v43  ;;  %v69_v12 = vld [vmem:[#allocation2 + $0xd8] sm:$0xff]  ;;  %v319_v15 = vld [vmem:[#allocation4 + $0x7a8] sm:$0xff]  ;;  %v1492_v19 = vpack.c.bf16 %v301_v9, %v300_v7 }
  0x72   :  { %1401 = vmatpush3.bf16.msra.mxu0 %v1400_v55  ;;  %v1454_v54 = vpack.c.bf16 %v283_v49, %v282_v48  ;;  %v266_v55 = vld [vmem:[#allocation4 + $0x600] sm:$0xff]  ;;  %v303_v25 = vld [vmem:[#allocation4 + $0x728] sm:$0xff]  ;;  %v288_v26 = vld [vmem:[#allocation4 + $0x6b0] sm:$0xff] }
  0x73   :  { %1403 = vmatprep.subr.bf16.mxu0 %v1402_v58  ;;  %v1486_v58 = vpack.c.bf16 %v315_v51, %v314_v50  ;;  %v1456_v0 = vpack.c.bf16 %v267_v56, %v266_v55  ;;  %v318_v14 = vld [vmem:[#allocation4 + $0x7a0] sm:$0xff]  ;;  %v289_v27 = vld [vmem:[#allocation4 + $0x6b8] sm:$0xff]  ;;  %v272_v35 = vld [vmem:[#allocation4 + $0x630] sm:$0xff] }
  0x74   :  { %1433 = vmatpush3.bf16.msra.mxu1 %v1432_v57  ;;  %v50_v57 = vld [vmem:[#allocation2 + $0x40] sm:$0xff]  ;;  %v1494_v24 = vpack.c.bf16 %v319_v15, %v318_v14  ;;  %v57_v32 = vld [vmem:[#allocation2 + $0x78] sm:$0xff]  ;;  %v304_v37 = vld [vmem:[#allocation4 + $0x730] sm:$0xff] }
  0x75   :  { %1435 = vmatprep.subr.bf16.mxu1 %v1434_v62  ;;  %v284_v62 = vld [vmem:[#allocation4 + $0x690] sm:$0xff]  ;;  %v270_v21 = vld [vmem:[#allocation4 + $0x620] sm:$0xff]  ;;  %v273_v36 = vld [vmem:[#allocation4 + $0x638] sm:$0xff] }
  0x76   :  { %1405 = vmatpush3.bf16.msra.mxu0 %v1404_v4  ;;  %v1488_v4 = vpack.c.bf16 %v299_v60, %v298_v59  ;;  %v1458_v8 = vpack.c.bf16 %v285_v63, %v284_v62  ;;  %v302_v23 = vld [vmem:[#allocation4 + $0x720] sm:$0xff]  ;;  %v305_v39 = vld [vmem:[#allocation4 + $0x738] sm:$0xff]  ;;  %v323_v43 = vld [vmem:[#allocation4 + $0x7c8] sm:$0xff]  ;;  %v1468_v44 = vpack.c.bf16 %v273_v36, %v272_v35 }
  0x77   :  { %1407 = vmatprep.subr.bf16.mxu0 %v1406_v6  ;;  %v269_v6 = vld [vmem:[#allocation4 + $0x618] sm:$0xff]  ;;  %v1496_v33 = vpack.c.bf16 %v303_v25, %v302_v23  ;;  %v1500_v45 = vpack.c.bf16 %v305_v39, %v304_v37  ;;  %v274_v47 = vld [vmem:[#allocation4 + $0x640] sm:$0xff]  ;;  %v275_v48 = vld [vmem:[#allocation4 + $0x648] sm:$0xff] }
  0x78   :  { %1437 = vmatpush3.bf16.msra.mxu1 %v1436_v5  ;;  %v268_v5 = vld [vmem:[#allocation4 + $0x610] sm:$0xff]  ;;  %v306_v49 = vld [vmem:[#allocation4 + $0x740] sm:$0xff]  ;;  %v307_v51 = vld [vmem:[#allocation4 + $0x748] sm:$0xff]  ;;  %v1472_v56 = vpack.c.bf16 %v275_v48, %v274_v47 }
  0x79   :  { %1439 = vmatprep.subr.bf16.mxu1 %v1438_v10  ;;  %v286_v10 = vld [vmem:[#allocation4 + $0x6a0] sm:$0xff]  ;;  %v325_v55 = vld [vmem:[#allocation4 + $0x7d8] sm:$0xff]  ;;  %v276_v59 = vld [vmem:[#allocation4 + $0x650] sm:$0xff] }
  0x7a   :  { %1409 = vmatpush3.bf16.msra.mxu0 %v1408_v16  ;;  %v66_v16 = vld [vmem:[#allocation2 + $0xc0] sm:$0xff]  ;;  %v1462_v20 = vpack.c.bf16 %v287_v11, %v286_v10  ;;  %v277_v60 = vld [vmem:[#allocation4 + $0x658] sm:$0xff]  ;;  %v327_v3 = vld [vmem:[#allocation4 + $0x7e8] sm:$0xff] }
  0x7b   :  { %1411 = vmatprep.subr.bf16.mxu0 %v1410_v18  ;;  %v68_v18 = vld [vmem:[#allocation2 + $0xd0] sm:$0xff]  ;;  %v309_v63 = vld [vmem:[#allocation4 + $0x758] sm:$0xff]  ;;  %v326_v2 = vld [vmem:[#allocation4 + $0x7e0] sm:$0xff] }
  0x7c   :  { %1441 = vmatpush3.bf16.msra.mxu1 %v1440_v17  ;;  %v1460_v17 = vpack.c.bf16 %v269_v6, %v268_v5  ;;  %v278_v7 = vld [vmem:[#allocation4 + $0x660] sm:$0xff]  ;;  %v1510_v10 = vpack.c.bf16 %v327_v3, %v326_v2  ;;  %v311_v11 = vld [vmem:[#allocation4 + $0x768] sm:$0xff]  ;;  %v328_v14 = vld [vmem:[#allocation4 + $0x7f0] sm:$0xff] }
  0x7d   :  { %1443 = vmatprep.subr.bf16.mxu1 %v1442_v22  ;;  %v271_v22 = vld [vmem:[#allocation4 + $0x628] sm:$0xff]  ;;  %v310_v9 = vld [vmem:[#allocation4 + $0x760] sm:$0xff]  ;;  %v329_v15 = vld [vmem:[#allocation4 + $0x7f8] sm:$0xff] }
  0x7e   :  { %1413 = vmatpush3.bf16.msra.mxu0 %v1412_v28  ;;  %v320_v28 = vld [vmem:[#allocation4 + $0x7b0] sm:$0xff]  ;;  %v1464_v31 = vpack.c.bf16 %v271_v22, %v270_v21  ;;  %v1514_v21 = vpack.c.bf16 %v329_v15, %v328_v14  ;;  %v313_v23 = vld [vmem:[#allocation4 + $0x778] sm:$0xff] }
  0x7f   :  { %1415 = vmatprep.subr.bf16.mxu0 %v1414_v30  ;;  %v55_v30 = vld [vmem:[#allocation2 + $0x68] sm:$0xff]  ;;  %v312_v22 = vld [vmem:[#allocation4 + $0x770] sm:$0xff] }
  0x80   :  { %1445 = vmatpush3.bf16.msra.mxu1 %v1444_v29  ;;  %v321_v29 = vld [vmem:[#allocation4 + $0x7b8] sm:$0xff]  ;;  %v1516_v25 = vpack.c.bf16 %v313_v23, %v312_v22 }
  0x81   :  { %1447 = vmatprep.subr.bf16.mxu1 %v1446_v34  ;;  %v1466_v34 = vpack.c.bf16 %v289_v27, %v288_v26  ;;  %v1498_v38 = vpack.c.bf16 %v321_v29, %v320_v28  ;;  %v54_v26 = vld [vmem:[#allocation2 + $0x60] sm:$0xff]  ;;  %v56_v27 = vld [vmem:[#allocation2 + $0x70] sm:$0xff]  ;;  %v71_v28 = vld [vmem:[#allocation2 + $0xe8] sm:$0xff] }
  0x82   :  { %1417 = vmatpush3.bf16.msra.mxu0 %v1416_v40  ;;  %v290_v40 = vld [vmem:[#allocation4 + $0x6c0] sm:$0xff]  ;;  %v73_v29 = vld [vmem:[#allocation2 + $0xf8] sm:$0xff] }
  0x83   :  { %1419 = vmatprep.subr.bf16.mxu0 %v1418_v42  ;;  %v322_v42 = vld [vmem:[#allocation4 + $0x7c0] sm:$0xff] }
  0x84   :  { %1449 = vmatpush3.bf16.msra.mxu1 %v1448_v41  ;;  %v291_v41 = vld [vmem:[#allocation4 + $0x6c8] sm:$0xff]  ;;  %v1502_v50 = vpack.c.bf16 %v323_v43, %v322_v42 }
  0x85   :  { %1451 = vmatprep.subr.bf16.mxu1 %v1450_v46  ;;  %v1470_v46 = vpack.c.bf16 %v291_v41, %v290_v40 }
  0x86   :  { %1421 = vmatpush3.bf16.msra.mxu0 %v1420_v52  ;;  %v292_v52 = vld [vmem:[#allocation4 + $0x6d0] sm:$0xff] }
  0x87   :  { %1455 = vmatprep.subr.bf16.mxu0 %v1454_v54  ;;  %v324_v54 = vld [vmem:[#allocation4 + $0x7d0] sm:$0xff] }
  0x88   :  { %1453 = vmatpush3.bf16.msra.mxu1 %v1452_v53  ;;  %v293_v53 = vld [vmem:[#allocation4 + $0x6d8] sm:$0xff]  ;;  %v1506_v62 = vpack.c.bf16 %v325_v55, %v324_v54 }
  0x89   :  { %1487 = vmatprep.subr.bf16.mxu1 %v1486_v58  ;;  %702 = vmatmul.mubr.f32.vlgmr.msra.gmra.mrb[8].mxu0 %v50_v57  ;;  %v1504_v57 = vpack.c.bf16 %v307_v51, %v306_v49  ;;  %v1474_v58 = vpack.c.bf16 %v293_v53, %v292_v52 }
  0x8a   :  { %1457 = vmatpush3.bf16.msra.mxu0 %v1456_v0  ;;  %706 = vmatprep.mubr.f32.mxu0 %v67_v1  ;;  %v294_v0 = vld [vmem:[#allocation4 + $0x6e0] sm:$0xff]  ;;  %v295_v1 = vld [vmem:[#allocation4 + $0x6e8] sm:$0xff] }
  0x8b   :  { %777 = vmatmul.mubr.f32.vlgmr.msra.gmra.mrb[8].mxu1 %v52_v61  ;;  %1459 = vmatprep.subr.bf16.mxu0 %v1458_v8  ;;  %v308_v61 = vld [vmem:[#allocation4 + $0x750] sm:$0xff]  ;;  %v1478_v6 = vpack.c.bf16 %v295_v1, %v294_v0  ;;  %v279_v8 = vld [vmem:[#allocation4 + $0x668] sm:$0xff] }
  0x8c   :  { %1489 = vmatpush3.bf16.msra.mxu1 %v1488_v4  ;;  %781 = vmatprep.mubr.f32.mxu1 %v69_v12  ;;  %v1476_v4 = vpack.c.bf16 %v277_v60, %v276_v59  ;;  %v1508_v5 = vpack.c.bf16 %v309_v63, %v308_v61  ;;  %v296_v12 = vld [vmem:[#allocation4 + $0x6f0] sm:$0xff] }
  0x8d   :  { %707 = vmatmul.mubr.f32.gmra.mrb[10].mxu0 %v66_v16  ;;  %1491 = vmatprep.subr.bf16.mxu1 %v1490_v13  ;;  %v297_v13 = vld [vmem:[#allocation4 + $0x6f8] sm:$0xff]  ;;  %v1480_v16 = vpack.c.bf16 %v279_v8, %v278_v7 }
  0x8e   :  { %1461 = vmatpush3.bf16.msra.mxu0 %v1460_v17  ;;  %851 = vmatprep.mubr.f32.mxu0 %v55_v30  ;;  %v1512_v17 = vpack.c.bf16 %v311_v11, %v310_v9  ;;  %v70_v30 = vld [vmem:[#allocation2 + $0xe0] sm:$0xff] }
  0x8f   :  { %782 = vmatmul.mubr.f32.gmra.mrb[10].mxu1 %v68_v18  ;;  %1463 = vmatprep.subr.bf16.mxu0 %v1462_v20  ;;  %v1482_v18 = vpack.c.bf16 %v297_v13, %v296_v12  ;;  %v281_v20 = vld [vmem:[#allocation4 + $0x678] sm:$0xff] }
  0x90   :  { %1493 = vmatpush3.bf16.msra.mxu1 %v1492_v19  ;;  %926 = vmatprep.mubr.f32.mxu1 %v57_v32  ;;  %v280_v19 = vld [vmem:[#allocation4 + $0x670] sm:$0xff] }
  0x91   :  { %1495 = vmatprep.subr.bf16.mxu1 %v1494_v24  ;;  %v1484_v24 = vpack.c.bf16 %v281_v20, %v280_v19 }
  0x92   :  { %1465 = vmatpush3.bf16.msra.mxu0 %v1464_v31  ;;  %v72_v31 = vld [vmem:[#allocation2 + $0xf0] sm:$0xff] }
  0x93   :  { %1467 = vmatprep.subr.bf16.mxu0 %v1466_v34 }
  0x94   :  { %1497 = vmatpush3.bf16.msra.mxu1 %v1496_v33  ;;  %v957_v33 = vld [vmem:[%s1635_s2] ss:$0 sm:$0xff] }
  0x95   :  { %1499 = vmatprep.subr.bf16.mxu1 %v1498_v38 }
  0x96   :  { %1469 = vmatpush3.bf16.msra.mxu0 %v1468_v44 }
  0x97   :  { %1471 = vmatprep.subr.bf16.mxu0 %v1470_v46 }
  0x98   :  { %1501 = vmatpush3.bf16.msra.mxu1 %v1500_v45 }
  0x99   :  { %1503 = vmatprep.subr.bf16.mxu1 %v1502_v50 }
  0x9a   :  { %1473 = vmatpush3.bf16.msra.mxu0 %v1472_v56 }
  0x9b   :  { %1475 = vmatprep.subr.bf16.mxu0 %v1474_v58 }
  0x9c   :  { %1505 = vmatpush3.bf16.msra.mxu1 %v1504_v57 }
  0x9d   :  { %1507 = vmatprep.subr.bf16.mxu1 %v1506_v62 }
  0x9e   :  { %1477 = vmatpush3.bf16.msra.mxu0 %v1476_v4 }
  0x9f   :  { %1479 = vmatprep.subr.bf16.mxu0 %v1478_v6 }
  0xa0   :  { %1509 = vmatpush3.bf16.msra.mxu1 %v1508_v5 }
  0xa1   :  { %1511 = vmatprep.subr.bf16.mxu1 %v1510_v10 }
  0xa2   :  { %1481 = vmatpush3.bf16.msra.mxu0 %v1480_v16 }
  0xa3   :  { %1483 = vmatprep.subr.bf16.mxu0 %v1482_v18 }
  0xa4   :  { %1513 = vmatpush3.bf16.msra.mxu1 %v1512_v17 }
  0xa5   :  { %1515 = vmatprep.subr.bf16.mxu1 %v1514_v21 }
  0xa6   :  { %1485 = vmatpush3.bf16.msra.mxu0 %v1484_v24 }
  0xa8   :  { %1517 = vmatpush3.bf16.msra.mxu1 %v1516_v25 }
  0xa9   :  { %852 = vmatmul.mubr.f32.vlgmr.msra.gmra.mrb[12].mxu0 %v54_v26 }
  0xaa   :  { %856 = vmatprep.mubr.f32.mxu0 %v71_v28 }
  0xab   :  { %927 = vmatmul.mubr.f32.vlgmr.msra.gmra.mrb[12].mxu1 %v56_v27 }
  0xac   :  { %931 = vmatprep.mubr.f32.mxu1 %v73_v29 }
  0xad   :  { %857 = vmatmul.mubr.f32.gmra.mrb[14].mxu0 %v70_v30 }
  0xaf   :  { %932 = vmatmul.mubr.f32.gmra.mrb[14].mxu1 %v72_v31 }
 0x11c   :  { %v990_v32 = vpop.f32.mrb[0].mxu0 }
 0x11d   :  { %v991_v34 = vpop.f32.mrb[1].mxu0 }
 0x11e   :  { %v1028_v35 = vpop.f32.mrb[0].mxu1  ;;  %v992_v36 = vadd.f32 %v991_v34, %v990_v32 }
 0x11f   :  { %v1029_v37 = vpop.f32.mrb[1].mxu1 }
 0x120   :  { %v1030_v38 = vadd.f32 %v1029_v37, %v1028_v35  ;;  %v404_v39 = vadd.f32 %v992_v36, %v957_v33  ;;  %v993_v41 = vpop.f32.mrb[2].mxu0 }
 0x121   :  { %v994_v42 = vpop.f32.mrb[3].mxu0 }
 0x122   :  { %v479_v40 = vadd.f32 %v1030_v38, %v404_v39  ;;  %v995_v43 = vadd.f32 %v994_v42, %v993_v41  ;;  %v1031_v44 = vpop.f32.mrb[2].mxu1 }
 0x123   :  { %v1032_v46 = vpop.f32.mrb[3].mxu1 }
 0x124   :  { %v409_v45 = vadd.f32 %v995_v43, %v957_v33  ;;  %v1033_v47 = vadd.f32 %v1032_v46, %v1031_v44 }
 0x126   :  { %v484_v48 = vadd.f32 %v1033_v47, %v409_v45 }
 0x13c   :  { %v1066_v49 = vpop.f32.mrb[4].mxu0 }
 0x13d   :  { %v1067_v50 = vpop.f32.mrb[5].mxu0 }
 0x13e   :  { %v1104_v51 = vpop.f32.mrb[4].mxu1  ;;  %v1068_v52 = vadd.f32 %v1067_v50, %v1066_v49 }
 0x13f   :  { %v1105_v53 = vpop.f32.mrb[5].mxu1 }
 0x140   :  { %v1106_v54 = vadd.f32 %v1105_v53, %v1104_v51  ;;  %v554_v55 = vadd.f32 %v1068_v52, %v479_v40  ;;  %v1069_v56 = vpop.f32.mrb[6].mxu0 }
 0x141   :  { %v1070_v57 = vpop.f32.mrb[7].mxu0 }
 0x142   :  { %v1107_v58 = vpop.f32.mrb[6].mxu1  ;;  %v629_v59 = vadd.f32 %v1106_v54, %v554_v55  ;;  %v1071_v60 = vadd.f32 %v1070_v57, %v1069_v56 }
 0x143   :  { %v1108_v61 = vpop.f32.mrb[7].mxu1 }
 0x144   :  { %v1109_v62 = vadd.f32 %v1108_v61, %v1107_v58  ;;  %v559_v63 = vadd.f32 %v1071_v60, %v484_v48 }
 0x146   :  { %v634_v0 = vadd.f32 %v1109_v62, %v559_v63 }
 0x15c   :  { %v1142_v1 = vpop.f32.mrb[8].mxu0 }
 0x15d   :  { %v1143_v2 = vpop.f32.mrb[9].mxu0 }
 0x15e   :  { %v1180_v3 = vpop.f32.mrb[8].mxu1  ;;  %v1144_v4 = vadd.f32 %v1143_v2, %v1142_v1 }
 0x15f   :  { %v1181_v5 = vpop.f32.mrb[9].mxu1 }
 0x160   :  { %v1182_v6 = vadd.f32 %v1181_v5, %v1180_v3  ;;  %v704_v7 = vadd.f32 %v1144_v4, %v629_v59  ;;  %v1145_v8 = vpop.f32.mrb[10].mxu0 }
 0x161   :  { %v1146_v9 = vpop.f32.mrb[11].mxu0 }
 0x162   :  { %v1183_v10 = vpop.f32.mrb[10].mxu1  ;;  %v779_v11 = vadd.f32 %v1182_v6, %v704_v7  ;;  %v1147_v12 = vadd.f32 %v1146_v9, %v1145_v8 }
 0x163   :  { %v1184_v13 = vpop.f32.mrb[11].mxu1 }
 0x164   :  { %v1185_v14 = vadd.f32 %v1184_v13, %v1183_v10  ;;  %v709_v15 = vadd.f32 %v1147_v12, %v634_v0 }
 0x166   :  { %v784_v16 = vadd.f32 %v1185_v14, %v709_v15 }
 0x17c   :  { %v1218_v17 = vpop.f32.mrb[12].mxu0 }
 0x17d   :  { %v1219_v18 = vpop.f32.mrb[13].mxu0 }
 0x17e   :  { %v1256_v19 = vpop.f32.mrb[12].mxu1  ;;  %v1220_v20 = vadd.f32 %v1219_v18, %v1218_v17 }
 0x17f   :  { %v1257_v21 = vpop.f32.mrb[13].mxu1 }
 0x180   :  { %v1258_v22 = vadd.f32 %v1257_v21, %v1256_v19  ;;  %v854_v23 = vadd.f32 %v1220_v20, %v779_v11  ;;  %v1221_v24 = vpop.f32.mrb[14].mxu0 }
 0x181   :  { %v1222_v25 = vpop.f32.mrb[15].mxu0 }
 0x182   :  { %v1259_v26 = vpop.f32.mrb[14].mxu1  ;;  %v1223_v27 = vadd.f32 %v1222_v25, %v1221_v24  ;;  %v929_v29 = vadd.f32 %v1258_v22, %v854_v23 }
 0x183   :  { %v1260_v28 = vpop.f32.mrb[15].mxu1 }
 0x184   :  { %v1261_v30 = vadd.f32 %v1260_v28, %v1259_v26  ;;  %v859_v31 = vadd.f32 %v1223_v27, %v784_v16  ;;  %v937_v32 = vmul.f32 %v929_v29, %v929_v29 }
 0x186   :  { %v934_v33 = vadd.f32 %v1261_v30, %v859_v31  ;;  %939 = vadd.xlane.f32.xlu0 %v937_v32 }
 0x188   :  { %v938_v34 = vmul.f32 %v934_v33, %v934_v33 }
 0x18a   :  { %941 = vadd.xlane.f32.xlu0 %v938_v34 }
 0x213   :  { %v940_v35 = vpop.xlane.xlu0 %939 }
 0x214   :  { %v943_v36 = vmax.f32 %v940_v35, 1e-24 }
 0x216   :  { %1523 = vrsqrt.f32 %v943_v36 }
 0x217   :  { %v942_v37 = vpop.xlane.xlu0 %941 }
 0x218   :  { %v944_v38 = vmax.f32 %v942_v37, 1e-24 }
 0x21a   :  { %1525 = vrsqrt.f32 %v944_v38 }
 0x220   :  { %v1524_v39 = vpop.eup %1523 }
 0x221   :  { %v947_v40 = vmul.f32 %v1524_v39, %v929_v29 }
 0x223   :  { %949 = vst [vmem:[%s1636_s3] sm:$0xff] %v947_v40 }
 0x224   :  { %v1526_v41 = vpop.eup %1525 }
 0x225   :  { %v948_v42 = vmul.f32 %v1526_v41, %v934_v33 }
 0x227   :  { %950 = vst [vmem:[%s1636_s3 + $0x8] sm:$0xff] %v948_v42 }
 0x228   :  { %955 = vsyncpa [#allocation3], 1 }
 0x229   :  { %956 = vsyncpa [#allocation5], 1 }

</bundles_post_ra>
